<compile_context>
chip_gen: v7x
topology: tpu7x:2x2x1
jax: 0.10.0
libtpu: 0.0.40
codegen_flags: <defaults>
</compile_context>

<pallas_src>
import numpy as np
import jax
import jax.numpy as jnp
from jax import lax
from jax.experimental import pallas as pl
from jax.experimental.pallas import tpu as pltpu


def _make_feat_agg_kernel(H, W):
    HW = H * W
    taps = [(dy, dx) for dy in (-1, 0, 1) for dx in (-1, 0, 1)]

    def kernel(xo_ref, xp_ref, xa_ref, w_ref, shift_ref, mask_ref, o_ref):
        # Fused 3-way sum on the unpadded, lane-dense (Cin, H*W) slab (fp32 VPU).
        x = (xo_ref[0].astype(jnp.float32)
             + xp_ref[0].astype(jnp.float32)
             + xa_ref[0].astype(jnp.float32))                  # (Cin, HW)

        masks = mask_ref[...]                                  # (9, HW), 0/1 f32

        # im2col: 9 shifted+masked copies stacked along the contraction axis.
        # A (dy, dx) spatial shift is a single static lane rotation of the flattened
        # H*W axis (XLU slot); out-of-image wrap-around is zeroed by the mask.
        slabs = []
        for t, (dy, dx) in enumerate(taps):
            d = dy * W + dx
            if d == 0:                                         # center tap: identity
                slabs.append(x)
            else:
                shifted = pltpu.roll(x, shift=(-d) % HW, axis=1)
                slabs.append(shifted * masks[t:t + 1, :])
        patches = jnp.concatenate(slabs, axis=0)               # (9*Cin, HW)

        # One MXU matmul, K = 9*Cin.  BatchNorm scale is already folded into w_ref.
        acc = jnp.dot(w_ref[...], patches,
                      preferred_element_type=jnp.float32)      # (Cout, HW)

        # Folded-BN shift + ReLU; lane-dense (Cout, HW) store -> unmasked vst.
        o_ref[0] = jnp.maximum(acc + shift_ref[...], 0.0).astype(o_ref.dtype)

    return kernel


def feat_agg(x_ori, x_p, x_a, conv_w, bn_gamma, bn_beta, bn_mean, bn_var, eps=1e-5):
    """FeatAgg forward.  x_* are NCHW, conv_w is (Cout, Cin, 3, 3).  Returns NCHW."""
    N, Cin, H, W = x_ori.shape
    Cout = conv_w.shape[0]
    HW = H * W

    # Flatten spatial onto the lane axis.  These reshapes are layout-preserving
    # (no HBM pass), unlike the previous NHWC transpose + pad.
    xo = x_ori.reshape(N, Cin, HW)
    xp = x_p.reshape(N, Cin, HW)
    xa = x_a.reshape(N, Cin, HW)

    # Fold BatchNorm (inference / running stats):  y = (scale*W) (*) x + shift.
    scale = bn_gamma.astype(jnp.float32) / jnp.sqrt(bn_var.astype(jnp.float32) + eps)
    shift = (bn_beta.astype(jnp.float32)
             - bn_mean.astype(jnp.float32) * scale).reshape(Cout, 1)
    # (Cout, Cin, 3, 3) -> (Cout, 3, 3, Cin) -> (Cout, 9*Cin); column = tap*Cin + ci.
    w_mat = (jnp.transpose(conv_w.astype(jnp.float32), (0, 2, 3, 1))
             .reshape(Cout, 9 * Cin) * scale[:, None])

    # Precomputed 0/1 border masks (one per 3x3 tap) over the flattened H*W axis.
    mask_np = np.zeros((9, H, W), dtype=np.float32)
    t = 0
    for dy in (-1, 0, 1):
        for dx in (-1, 0, 1):
            mask_np[t, max(0, -dy):min(H, H - dy), max(0, -dx):min(W, W - dx)] = 1.0
            t += 1
    masks = jnp.asarray(mask_np.reshape(9, HW))

    kernel = _make_feat_agg_kernel(H, W)

    # VMEM budget from the actual block sizes (+ in-kernel temporaries).
    f32b = 4
    blk_in, blk_out, blk_mask = Cin * HW * f32b, Cout * HW * f32b, 9 * HW * f32b
    temps = (1 + 2 * 9) * blk_in + 2 * blk_out + blk_mask      # x, slabs+patches, acc/y
    vmem_bytes = 3 * 2 * blk_in + 2 * blk_mask + 2 * blk_out + temps + (1 << 12)
    vmem_limit = int(min(max(2 * vmem_bytes, 8 << 20), 96 << 20))

    cost = pl.CostEstimate(
        flops=int(N * HW * (2 * Cout * 9 * Cin + 2 * Cin + 2 * Cout)),
        transcendentals=0,
        bytes_accessed=int(f32b * (N * HW * (3 * Cin + Cout) + 9 * HW
                                   + Cout * (9 * Cin + 1))))

    out_flat = pl.pallas_call(
        kernel,
        out_shape=jax.ShapeDtypeStruct((N, Cout, HW), x_ori.dtype),
        grid_spec=pltpu.PrefetchScalarGridSpec(
            num_scalar_prefetch=0,
            grid=(N,),                                          # one image per step
            in_specs=[
                pl.BlockSpec((1, Cin, HW), lambda b: (b, 0, 0)),
                pl.BlockSpec((1, Cin, HW), lambda b: (b, 0, 0)),
                pl.BlockSpec((1, Cin, HW), lambda b: (b, 0, 0)),
                pl.BlockSpec((Cout, 9 * Cin), lambda b: (0, 0)),  # BN-folded weights
                pl.BlockSpec((Cout, 1), lambda b: (0, 0)),        # BN shift
                pl.BlockSpec((9, HW), lambda b: (0, 0)),          # border masks
            ],
            out_specs=pl.BlockSpec((1, Cout, HW), lambda b: (b, 0, 0)),
        ),
        compiler_params=pltpu.CompilerParams(
            dimension_semantics=("parallel",),
            vmem_limit_bytes=vmem_limit,
        ),
        cost_estimate=cost,
    )(xo, xp, xa, w_mat, shift, masks)

    # (N, Cout, H*W) -> NCHW; layout-preserving reshape, no transpose pass.
    return out_flat.reshape(N, Cout, H, W)


def feat_agg_reference(x_ori, x_p, x_a, conv_w, gamma, beta, mean, var, eps=1e-5):
    x = x_ori + x_p + x_a
    y = lax.conv_general_dilated(
        x, conv_w, window_strides=(1, 1), padding=((1, 1), (1, 1)),
        dimension_numbers=("NCHW", "OIHW", "NCHW"))
    inv = 1.0 / jnp.sqrt(var + eps)
    y = (y - mean[None, :, None, None]) * inv[None, :, None, None]
    y = y * gamma[None, :, None, None] + beta[None, :, None, None]
    return jnp.maximum(y, 0.0)


if __name__ == "__main__":
    N, Cin, Cout, H, W = 2, 4, 8, 16, 16

    key = jax.random.PRNGKey(0)
    k1, k2, k3, k4, k5, k6, k7, k8 = jax.random.split(key, 8)

    x_ori = jax.random.normal(k1, (N, Cin, H, W), dtype=jnp.float32)
    x_p = jax.random.normal(k2, (N, Cin, H, W), dtype=jnp.float32)
    x_a = jax.random.normal(k3, (N, Cin, H, W), dtype=jnp.float32)

    # Conv2d(Cin, Cout, kernel_size=3, bias=False): weight (Cout, Cin, 3, 3)
    conv_w = jax.random.normal(k4, (Cout, Cin, 3, 3), dtype=jnp.float32) * 0.1
    # BatchNorm2d(Cout) parameters / running stats (inference semantics)
    bn_gamma = 1.0 + 0.1 * jax.random.normal(k5, (Cout,), dtype=jnp.float32)
    bn_beta = 0.1 * jax.random.normal(k6, (Cout,), dtype=jnp.float32)
    bn_mean = 0.1 * jax.random.normal(k7, (Cout,), dtype=jnp.float32)
    bn_var = jnp.abs(jax.random.normal(k8, (Cout,), dtype=jnp.float32)) + 0.5

    out = feat_agg(x_ori, x_p, x_a, conv_w, bn_gamma, bn_beta, bn_mean, bn_var)
    out = jax.block_until_ready(out)

    ref = feat_agg_reference(x_ori, x_p, x_a, conv_w, bn_gamma, bn_beta,
                             bn_mean, bn_var)
    ref = jax.block_until_ready(ref)

    assert out.shape == (N, Cout, H, W)
    assert jnp.allclose(out, ref, rtol=1e-4, atol=1e-4)
    print("KERNEL_OK")
</pallas_src>

<mosaic_0001>
module attributes {stable_mosaic.version = 11 : i64} {
  func.func @kernel(%arg0: i32, %arg1: memref<1x4x256xf32, #tpu.memory_space<vmem>>, %arg2: memref<1x4x256xf32, #tpu.memory_space<vmem>>, %arg3: memref<1x4x256xf32, #tpu.memory_space<vmem>>, %arg4: memref<8x36xf32, #tpu.memory_space<vmem>>, %arg5: memref<8x1xf32, #tpu.memory_space<vmem>>, %arg6: memref<9x256xf32, #tpu.memory_space<vmem>>, %arg7: memref<1x8x256xf32, #tpu.memory_space<vmem>>) attributes {dimension_semantics = [#tpu.dimension_semantics<parallel>], iteration_bounds = array<i64: 2>, scalar_prefetch = 0 : i64, scratch_operands = 0 : i64, tpu.core_type = #tpu.core_type<tc>, window_params = [{transform_indices = @transform_0, window_bounds = array<i64: 1, 4, 256>}, {transform_indices = @transform_1, window_bounds = array<i64: 1, 4, 256>}, {transform_indices = @transform_2, window_bounds = array<i64: 1, 4, 256>}, {pipeline_mode = #tpu.pipeline_mode<synchronous>, transform_indices = @transform_3, window_bounds = array<i64: 8, 36>}, {pipeline_mode = #tpu.pipeline_mode<synchronous>, transform_indices = @transform_4, window_bounds = array<i64: 8, 1>}, {pipeline_mode = #tpu.pipeline_mode<synchronous>, transform_indices = @transform_5, window_bounds = array<i64: 9, 256>}, {transform_indices = @transform_6, window_bounds = array<i64: 1, 8, 256>}]} {
    %c0 = arith.constant 0 : index
    %c0_0 = arith.constant 0 : index
    %c0_1 = arith.constant 0 : index
    %0 = vector.load %arg1[%c0, %c0_0, %c0_1] : memref<1x4x256xf32, #tpu.memory_space<vmem>>, vector<1x4x256xf32>
    %1 = vector.shape_cast %0 : vector<1x4x256xf32> to vector<4x256xf32>
    %c0_2 = arith.constant 0 : index
    %c0_3 = arith.constant 0 : index
    %c0_4 = arith.constant 0 : index
    %2 = vector.load %arg2[%c0_2, %c0_3, %c0_4] : memref<1x4x256xf32, #tpu.memory_space<vmem>>, vector<1x4x256xf32>
    %3 = vector.shape_cast %2 : vector<1x4x256xf32> to vector<4x256xf32>
    %4 = arith.addf %1, %3 : vector<4x256xf32>
    %c0_5 = arith.constant 0 : index
    %c0_6 = arith.constant 0 : index
    %c0_7 = arith.constant 0 : index
    %5 = vector.load %arg3[%c0_5, %c0_6, %c0_7] : memref<1x4x256xf32, #tpu.memory_space<vmem>>, vector<1x4x256xf32>
    %6 = vector.shape_cast %5 : vector<1x4x256xf32> to vector<4x256xf32>
    %7 = arith.addf %4, %6 : vector<4x256xf32>
    %c0_8 = arith.constant 0 : index
    %c0_9 = arith.constant 0 : index
    %8 = vector.load %arg6[%c0_8, %c0_9] : memref<9x256xf32, #tpu.memory_space<vmem>>, vector<9x256xf32>
    %c17_i32 = arith.constant 17 : i32
    %9 = tpu.dynamic_rotate %7 by %c17_i32 dim 1 : vector<4x256xf32>, i32 -> vector<4x256xf32>
    %10 = vector.extract_strided_slice %8 {offsets = [0, 0], sizes = [1, 256], strides = [1, 1]} : vector<9x256xf32> to vector<1x256xf32>
    %11 = vector.broadcast %10 : vector<1x256xf32> to vector<4x256xf32>
    %12 = arith.mulf %9, %11 : vector<4x256xf32>
    %c16_i32 = arith.constant 16 : i32
    %13 = tpu.dynamic_rotate %7 by %c16_i32 dim 1 : vector<4x256xf32>, i32 -> vector<4x256xf32>
    %14 = vector.extract_strided_slice %8 {offsets = [1, 0], sizes = [1, 256], strides = [1, 1]} : vector<9x256xf32> to vector<1x256xf32>
    %15 = vector.broadcast %14 : vector<1x256xf32> to vector<4x256xf32>
    %16 = arith.mulf %13, %15 : vector<4x256xf32>
    %c15_i32 = arith.constant 15 : i32
    %17 = tpu.dynamic_rotate %7 by %c15_i32 dim 1 : vector<4x256xf32>, i32 -> vector<4x256xf32>
    %18 = vector.extract_strided_slice %8 {offsets = [2, 0], sizes = [1, 256], strides = [1, 1]} : vector<9x256xf32> to vector<1x256xf32>
    %19 = vector.broadcast %18 : vector<1x256xf32> to vector<4x256xf32>
    %20 = arith.mulf %17, %19 : vector<4x256xf32>
    %c1_i32 = arith.constant 1 : i32
    %21 = tpu.dynamic_rotate %7 by %c1_i32 dim 1 : vector<4x256xf32>, i32 -> vector<4x256xf32>
    %22 = vector.extract_strided_slice %8 {offsets = [3, 0], sizes = [1, 256], strides = [1, 1]} : vector<9x256xf32> to vector<1x256xf32>
    %23 = vector.broadcast %22 : vector<1x256xf32> to vector<4x256xf32>
    %24 = arith.mulf %21, %23 : vector<4x256xf32>
    %c255_i32 = arith.constant 255 : i32
    %25 = tpu.dynamic_rotate %7 by %c255_i32 dim 1 : vector<4x256xf32>, i32 -> vector<4x256xf32>
    %26 = vector.extract_strided_slice %8 {offsets = [5, 0], sizes = [1, 256], strides = [1, 1]} : vector<9x256xf32> to vector<1x256xf32>
    %27 = vector.broadcast %26 : vector<1x256xf32> to vector<4x256xf32>
    %28 = arith.mulf %25, %27 : vector<4x256xf32>
    %c241_i32 = arith.constant 241 : i32
    %29 = tpu.dynamic_rotate %7 by %c241_i32 dim 1 : vector<4x256xf32>, i32 -> vector<4x256xf32>
    %30 = vector.extract_strided_slice %8 {offsets = [6, 0], sizes = [1, 256], strides = [1, 1]} : vector<9x256xf32> to vector<1x256xf32>
    %31 = vector.broadcast %30 : vector<1x256xf32> to vector<4x256xf32>
    %32 = arith.mulf %29, %31 : vector<4x256xf32>
    %c240_i32 = arith.constant 240 : i32
    %33 = tpu.dynamic_rotate %7 by %c240_i32 dim 1 : vector<4x256xf32>, i32 -> vector<4x256xf32>
    %34 = vector.extract_strided_slice %8 {offsets = [7, 0], sizes = [1, 256], strides = [1, 1]} : vector<9x256xf32> to vector<1x256xf32>
    %35 = vector.broadcast %34 : vector<1x256xf32> to vector<4x256xf32>
    %36 = arith.mulf %33, %35 : vector<4x256xf32>
    %c239_i32 = arith.constant 239 : i32
    %37 = tpu.dynamic_rotate %7 by %c239_i32 dim 1 : vector<4x256xf32>, i32 -> vector<4x256xf32>
    %38 = vector.extract_strided_slice %8 {offsets = [8, 0], sizes = [1, 256], strides = [1, 1]} : vector<9x256xf32> to vector<1x256xf32>
    %39 = vector.broadcast %38 : vector<1x256xf32> to vector<4x256xf32>
    %40 = arith.mulf %37, %39 : vector<4x256xf32>
    %41 = tpu.concatenate %12, %16, %20, %24, %7, %28, %32, %36, %40 in 0 : vector<4x256xf32>, vector<4x256xf32>, vector<4x256xf32>, vector<4x256xf32>, vector<4x256xf32>, vector<4x256xf32>, vector<4x256xf32>, vector<4x256xf32>, vector<4x256xf32> -> vector<36x256xf32>
    %c0_10 = arith.constant 0 : index
    %c0_11 = arith.constant 0 : index
    %42 = vector.load %arg4[%c0_10, %c0_11] : memref<8x36xf32, #tpu.memory_space<vmem>>, vector<8x36xf32>
    %cst = arith.constant dense<0.000000e+00> : vector<8x256xf32>
    %43 = tpu.matmul %42, %41, %cst {dimension_numbers = #tpu.dot_dimension_numbers<[1], [0], [0], [1], [0, 0, 1, 1], [], []>} : vector<8x36xf32>, vector<36x256xf32>, vector<8x256xf32> -> vector<8x256xf32>
    %c0_12 = arith.constant 0 : index
    %c0_13 = arith.constant 0 : index
    %44 = vector.load %arg5[%c0_12, %c0_13] : memref<8x1xf32, #tpu.memory_space<vmem>>, vector<8x1xf32>
    %45 = vector.broadcast %44 : vector<8x1xf32> to vector<8x256xf32>
    %46 = arith.addf %43, %45 : vector<8x256xf32>
    %cst_14 = arith.constant 0.000000e+00 : f32
    %47 = vector.broadcast %cst_14 : f32 to vector<8x256xf32>
    %48 = arith.maximumf %46, %47 : vector<8x256xf32>
    %c0_15 = arith.constant 0 : index
    %c0_16 = arith.constant 0 : index
    %c0_17 = arith.constant 0 : index
    %49 = vector.load %arg7[%c0_15, %c0_16, %c0_17] : memref<1x8x256xf32, #tpu.memory_space<vmem>>, vector<1x8x256xf32>
    %50 = vector.shape_cast %49 : vector<1x8x256xf32> to vector<8x256xf32>
    %51 = vector.shape_cast %48 : vector<8x256xf32> to vector<1x8x256xf32>
    tpu.vector_store %arg7[%c0_15, %c0_16, %c0_17], %51 {strides = array<i32>} : memref<1x8x256xf32, #tpu.memory_space<vmem>>, vector<1x8x256xf32>,
    return
  }
  func.func @transform_0(%arg0: i32) -> (i32, i32, i32) {
    %c0_i32 = arith.constant 0 : i32
    %c0_i32_0 = arith.constant 0 : i32
    %c0_i32_1 = arith.constant 0 : i32
    return %arg0, %c0_i32, %c0_i32_0 : i32, i32, i32
  }
  func.func @transform_1(%arg0: i32) -> (i32, i32, i32) {
    %c0_i32 = arith.constant 0 : i32
    %c0_i32_0 = arith.constant 0 : i32
    %c0_i32_1 = arith.constant 0 : i32
    return %arg0, %c0_i32, %c0_i32_0 : i32, i32, i32
  }
  func.func @transform_2(%arg0: i32) -> (i32, i32, i32) {
    %c0_i32 = arith.constant 0 : i32
    %c0_i32_0 = arith.constant 0 : i32
    %c0_i32_1 = arith.constant 0 : i32
    return %arg0, %c0_i32, %c0_i32_0 : i32, i32, i32
  }
  func.func @transform_3(%arg0: i32) -> (i32, i32) {
    %c0_i32 = arith.constant 0 : i32
    %c0_i32_0 = arith.constant 0 : i32
    %c0_i32_1 = arith.constant 0 : i32
    return %c0_i32, %c0_i32_0 : i32, i32
  }
  func.func @transform_4(%arg0: i32) -> (i32, i32) {
    %c0_i32 = arith.constant 0 : i32
    %c0_i32_0 = arith.constant 0 : i32
    %c0_i32_1 = arith.constant 0 : i32
    return %c0_i32, %c0_i32_0 : i32, i32
  }
  func.func @transform_5(%arg0: i32) -> (i32, i32) {
    %c0_i32 = arith.constant 0 : i32
    %c0_i32_0 = arith.constant 0 : i32
    %c0_i32_1 = arith.constant 0 : i32
    return %c0_i32, %c0_i32_0 : i32, i32
  }
  func.func @transform_6(%arg0: i32) -> (i32, i32, i32) {
    %c0_i32 = arith.constant 0 : i32
    %c0_i32_0 = arith.constant 0 : i32
    %c0_i32_1 = arith.constant 0 : i32
    return %arg0, %c0_i32, %c0_i32_0 : i32, i32, i32
  }
}

</mosaic_0001>

<bundles_post_ra>
// kernel: tpu_custom_call.1
= control target key start
LH: loop header
LB: loop body
LE: loop exit
PB: predicated region body
PF: predicated region fallthrough
CT: control target
= control target key end

     0   :  { %s1503_s0 = inlined_call_operand.hbm [shape: f32[2,4,256], index: 0, kind: input, shape index: {}]   ;;  %s1504_s1 = inlined_call_operand.hbm [shape: f32[2,4,256], index: 1, kind: input, shape index: {}]   ;;  %s1505_s2 = inlined_call_operand.vmem [shape: f32[2,4,256], index: 2, kind: input, shape index: {}]   ;;  %s1506_s3 = inlined_call_operand.hbm [shape: f32[8,36], index: 3, kind: input, shape index: {}]   ;;  %s1507_s4 = inlined_call_operand.vmem [shape: f32[8,1], index: 4, kind: input, shape index: {}]   ;;  %s1508_s5 = inlined_call_operand.hbm [shape: f32[9,256], index: 5, kind: input, shape index: {}]   ;;  %s1509_s6 = inlined_call_operand.hbm [shape: f32[2,8,256], index: 6, kind: output, shape index: {}]  }
   0x1   :  { %1514 = sst [smem:[#allocation17_spill]] %s1506_s3 }
   0x2   :  { %1515 = sst [smem:[#allocation18_spill]] %s1508_s5 }
   0x3   :  { %11 = vsyncpa [#allocation3], 0 }
   0x4   :  { %13 = vsyncpa [#allocation3 + $0x1], 0 }
   0x5   :  { %14 = vsyncpa [#allocation6], 0 }
   0x6   :  { %16 = vsyncpa [#allocation6 + $0x1], 0 }
   0x7   :  { %17 = vsyncpa [#allocation9], 0 }
   0x8   :  { %18 = vsyncpa [#allocation4], 0 }
   0x9   :  { %20 = vsyncpa [#allocation4 + $0x1], 0  ;;  %s1141_s21 = smov 0   ;;  %s1143_s22 = smov 0  }
   0xa   :  { %s1145_s23 = smov 0   ;;  %s1147_s24 = smov 0  }
   0xb LB: > { %s1162_s25 = sadd.s32 4294967295, %s1087_s24   ;;  %s767_s26 = sadd.s32 4294967294, %s1087_s24   ;;  %s1087_s24 = sphi %s1147_s24, %s1539_s24   ;;  %s1083_s23 = sphi %s1145_s23, %s1538_s23   ;;  %s1079_s22 = sphi %s1143_s22, %s1537_s22   ;;  %s1075_s21 = sphi %s1141_s21, %s1536_s21  }
   0xc   : > { %p46_p0 = scmp.ne.s32.totalorder %s1079_s22, %s1075_s21  ;;  %p1510_p1 = scmp.eq.s32.totalorder %s1162_s25, 0 }
   0xd   : > { %p191_p3 = scmp.eq.s32.totalorder %s767_s26, 1  ;;  %p768_p5 = scmp.ge.s32.totalorder %s1087_s24, 1 }
   0xe   : > { %p1171_p4 = por %p1510_p1, %p46_p0  ;;  %p198_p7 = scmp.lt.s32.totalorder %s1087_s24, 3 }
   0xf   : > { %p1176_p6 = por %p191_p3, %p46_p0  ;;  %s1089_s30 = smov [#allocation7]  }
  0x10   : > { %s1516_s27 = scalar_select %p1171_p4, 1, 0 }
  0x11   : > { %s1517_s28 = scalar_select %p1176_p6, 1, 0 }
  0x12   : > { %p1181_p8 = pnand %p768_p5, %p198_p7  ;;  %s211_s7 = sshll.u32 %s1089_s30, 4  ;;  %s212_s7 = int_to_ptr.vmem [resolvable:$true] %s211_s7 }
  0x13   : > { %s1090_s8 = smov [#allocation8]   ;;  %s1520_s3 = sld [smem:[#allocation17_spill]] }
  0x14   : > { %s1518_s29 = scalar_select %p1181_p8, 1, 0 }
  0x15   : > { %p822_p10 = pneg %p1181_p8  ;;  %s224_s9 = sshll.u32 %s1090_s8, 4  ;;  %s1194_s9 = int_to_ptr.vmem [resolvable:$true] %s224_s9 }
  0x17   : > { %p1190_p11 = pnand %p822_p10, %p1510_p1 }
  0x19   : > { %s893_s13 = scalar_lea.hbm %s1520_s3, 128  ;;  %p895_p13 = pneg %p1190_p11 }
  0x1a   : > { %p894_p12 = scmp.ne.s32.totalorder %s1520_s3, %s893_s13  ;;  %p900_p5 = scmp.lt.u32.totalorder %s893_s13, %s1520_s3 }
  0x1c   : > { %p896_p0 = pnand %p895_p13, %p894_p12 }
  0x1e   : > { %p897_p3 = pneg %p896_p0 }
  0x20   : > { %p902_p7 = pnand %p900_p5, %p897_p3 }
  0x22   : > { %905 = shalt.err (!%p902_p7)
}
  0x23   : > { %s906_s18 = scalar_lea.vmem %s212_s7, 128  ;;  %p914_p2 = scmp.lt.s32.totalorder %s212_s7, %s212_s7 }
  0x24   : > { %p907_p10 = scmp.ne.s32.totalorder %s212_s7, %s906_s18  ;;  %p915_p6 = scmp.lt.s32.totalorder %s906_s18, %s906_s18 }
  0x26   : > { %p909_p9 = pnand %p907_p10, %p895_p13  ;;  %p916_p4 = por %p915_p6, %p914_p2 }
  0x28   : > { %p910_p1 = pneg %p909_p9 }
  0x2a   : > { %p917_p8 = pnand %p916_p4, %p910_p1 }
  0x2c   : > { %920 = shalt.err (!%p917_p8)
}
  0x2d   : > { %825 = dma.hbm_to_vmem [thread:$0]  (!%p1190_p11), %s1520_s3, 128, %s212_s7, [#allocation6]  }
  0x2e   : > { %s1521_s5 = sld [smem:[#allocation18_spill]] }
  0x34   : > { %s921_s8 = scalar_lea.hbm %s1521_s5, 512 }
  0x35   : > { %p922_p9 = scmp.ne.s32.totalorder %s1521_s5, %s921_s8  ;;  %p928_p4 = scmp.lt.u32.totalorder %s921_s8, %s1521_s5 }
  0x37   : > { %p924_p2 = pnand %p922_p9, %p895_p13 }
  0x39   : > { %p925_p1 = pneg %p924_p2 }
  0x3b   : > { %p930_p6 = pnand %p928_p4, %p925_p1 }
  0x3d   : > { %933 = shalt.err (!%p930_p6)
}
  0x3e   : > { %s934_s7 = scalar_lea.vmem %s1194_s9, 512  ;;  %p942_p3 = scmp.lt.s32.totalorder %s1194_s9, %s1194_s9 }
  0x3f   : > { %p935_p8 = scmp.ne.s32.totalorder %s1194_s9, %s934_s7  ;;  %p943_p5 = scmp.lt.s32.totalorder %s934_s7, %s934_s7 }
  0x41   : > { %p937_p12 = pnand %p935_p8, %p895_p13  ;;  %p944_p7 = por %p943_p5, %p942_p3 }
  0x43   : > { %p938_p0 = pneg %p937_p12 }
  0x45   : > { %p945_p10 = pnand %p944_p7, %p938_p0 }
  0x47   : > { %948 = shalt.err (!%p945_p10)
}
  0x48   : > { %s1091_s15 = smov 256   ;;  %s1092_s16 = smov 16  }
  0x49   : > { %828 = dma.hbm_to_vmem [thread:$0]  (!%p1190_p11), %s1521_s5, 512, %s1194_s9, [#allocation9], %s1091_s15, %s1091_s15, %s1092_s16  }
  0x4a   : > { %s1244_s19 = sadd.s32 1, %s1087_s24   ;;  %s33_s20 = sadd.s32 1, %s1083_s23 }
  0x4b   : > { %s30_s26 = ssub.s32 %s1087_s24, %s1244_s19  ;;  %p40_p13 = scmp.ne.s32.totalorder %s1083_s23, %s1079_s22 }
  0x4c   : > { %p31_p9 = scmp.eq.s32.totalorder %s30_s26, 0  ;;  %p41_p2 = scmp.eq.s32.totalorder %s1087_s24, 0 }
  0x4d   : > { %p1522_p1 = scmp.eq.s32.totalorder %s1162_s25, 1  ;;  %p842_p6 = scmp.lt.s32.totalorder %s1087_s24, 2 }
  0x4e   : > { %s1260_s10 = scalar_select %p31_p9, %s1083_s23, %s33_s20  }
  0x4f   : > { %p1254_p4 = por %p1522_p1, %p40_p13  ;;  %p42_p8 = por %p41_p2, %p40_p13 }
  0x50   : > { %1524 = sst [smem:[#allocation16_spill]] %s1260_s10  ;;  %s238_s8 = sand.u32 1, %s1083_s23  }
  0x51   : > { %s1523_s30 = scalar_select %p1254_p4, 1, 0 }
  0x52   : > { %s1263_s9 = sshll.u32 %s238_s8, 3  ;;  %s796_s11 = sshll.u32 %s1087_s24, 7 }
  0x53   : > { %s1269_s14 = scalar_lea.hbm %s1503_s0, %s796_s11  ;;  %s242_s7 = scalar_lea.vmem [#allocation2], %s1263_s9 }
  0x54   : > { %s250_s15 = sshll.u32 %s242_s7, 4  ;;  %p1274_p11 = pnand %p842_p6, %p42_p8  ;;  %s1272_s15 = int_to_ptr.vmem [resolvable:$true] %s250_s15 }
  0x55   : > { %s1281_s20 = scalar_lea.hbm %s1504_s1, %s796_s11  ;;  %s257_s26 = sand.u32 1, %s1087_s24  }
  0x56   : > { %s239_s12 = scalar_lea.sflag [#allocation3], %s238_s8  ;;  %s949_s13 = scalar_lea.hbm %s1269_s14, 128 }
  0x57   : > { %p950_p12 = scmp.ne.s32.totalorder %s1269_s14, %s949_s13  ;;  %p951_p0 = pneg %p1274_p11 }
  0x58   : > { %s954_s5 = scalar_lea.hbm %s1503_s0, 256  ;;  %p955_p7 = scmp.lt.u32.totalorder %s1269_s14, %s1503_s0 }
  0x59   : > { %p952_p3 = pnand %p951_p0, %p950_p12  ;;  %p956_p10 = scmp.lt.u32.totalorder %s954_s5, %s949_s13 }
  0x5a   : > { %p958_p9 = scmp.lt.u32.totalorder %s949_s13, %s1269_s14 }
  0x5b   : > { %p953_p5 = pneg %p952_p3  ;;  %p957_p13 = por %p956_p10, %p955_p7 }
  0x5d   : > { %p959_p2 = por %p958_p9, %p957_p13 }
  0x5f   : > { %p960_p1 = pnand %p959_p2, %p953_p5 }
  0x61   : > { %963 = shalt.err (!%p960_p1)
}
  0x62   : > { %s964_s8 = scalar_lea.vmem %s1272_s15, 128  ;;  %s1093_s3 = smov [#allocation2]  }
  0x63   : > { %p965_p6 = scmp.ne.s32.totalorder %s1272_s15, %s964_s8  ;;  %s969_s11 = sshll.u32 %s1093_s3, 4  ;;  %s970_s11 = int_to_ptr.vmem [resolvable:$false] %s969_s11 }
  0x64   : > { %s971_s10 = scalar_lea.vmem %s970_s11, 256  ;;  %p972_p3 = scmp.lt.s32.totalorder %s1272_s15, %s970_s11 }
  0x65   : > { %p967_p8 = pnand %p965_p6, %p951_p0  ;;  %p973_p7 = scmp.lt.s32.totalorder %s971_s10, %s964_s8 }
  0x67   : > { %p968_p12 = pneg %p967_p8  ;;  %p974_p10 = por %p973_p7, %p972_p3 }
  0x69   : > { %p975_p13 = pnand %p974_p10, %p968_p12 }
  0x6b   : > { %978 = shalt.err (!%p975_p13)
}
  0x6c   : > { %832 = dma.hbm_to_vmem [thread:$0]  (!%p1274_p11), %s1269_s14, 128, %s1272_s15, %s239_s12  }
  0x6d   : > { %s261_s5 = scalar_lea.vmem [#allocation5], %s1263_s9  ;;  %s258_s13 = scalar_lea.sflag [#allocation6], %s257_s26 }
  0x6e   : > { %s269_s18 = sshll.u32 %s261_s5, 4  ;;  %s979_s7 = scalar_lea.hbm %s1281_s20, 128  ;;  %s270_s18 = int_to_ptr.vmem [resolvable:$true] %s269_s18 }
  0x6f   : > { %p980_p5 = scmp.ne.s32.totalorder %s1281_s20, %s979_s7  ;;  %s984_s3 = scalar_lea.hbm %s1504_s1, 256 }
  0x70   : > { %p985_p1 = scmp.lt.u32.totalorder %s1281_s20, %s1504_s1  ;;  %p986_p6 = scmp.lt.u32.totalorder %s984_s3, %s979_s7 }
  0x71   : > { %p982_p9 = pnand %p980_p5, %p951_p0  ;;  %p988_p12 = scmp.lt.u32.totalorder %s979_s7, %s1281_s20 }
  0x72   : > { %p987_p8 = por %p986_p6, %p985_p1 }
  0x73   : > { %p983_p2 = pneg %p982_p9 }
  0x74   : > { %p989_p3 = por %p988_p12, %p987_p8 }
  0x76   : > { %p990_p7 = pnand %p989_p3, %p983_p2 }
  0x78   : > { %993 = shalt.err (!%p990_p7)
}
  0x79   : > { %s994_s9 = scalar_lea.vmem %s270_s18, 128  ;;  %s1094_s14 = smov [#allocation5]  }
  0x7a   : > { %p995_p10 = scmp.ne.s32.totalorder %s270_s18, %s994_s9  ;;  %s999_s15 = sshll.u32 %s1094_s14, 4  ;;  %s1000_s15 = int_to_ptr.vmem [resolvable:$false] %s999_s15 }
  0x7b   : > { %s1001_s26 = scalar_lea.vmem %s1000_s15, 256  ;;  %p1002_p9 = scmp.lt.s32.totalorder %s270_s18, %s1000_s15 }
  0x7c   : > { %p997_p13 = pnand %p995_p10, %p951_p0  ;;  %p1003_p4 = scmp.lt.s32.totalorder %s1001_s26, %s994_s9 }
  0x7e   : > { %p998_p5 = pneg %p997_p13  ;;  %p1004_p1 = por %p1003_p4, %p1002_p9 }
  0x80   : > { %p1005_p6 = pnand %p1004_p1, %p998_p5 }
  0x82   : > { %1008 = shalt.err (!%p1005_p6)
}
  0x83   : > { %835 = dma.hbm_to_vmem [thread:$0]  (!%p1274_p11), %s1281_s20, 128, %s270_s18, %s258_s13  }
  0x84   : > { %p1526_p2 = scmp.ne.s32.totalorder %s1518_s29, 0 }
  0x85   : > { %s1334_s12 = sand.u32 (!%p1526_p2), 1, %s1079_s22   ;;  %p1527_p0 = scmp.ne.s32.totalorder (!%p1526_p2), %s1516_s27, 0 }
  0x86   : > { %286 = sbr.rel (%p1526_p2) target bundleno = 542 (0x21e), region = 44  ;;  %s779_s5 = sshll.u32 (!%p1526_p2), %s1334_s12, 3 }
  0x87   : > { %s289_s7 = scalar_lea.sflag (!%p1526_p2), [#allocation3], %s1334_s12  ;;  %s292_s17 = scalar_lea.vmem (!%p1526_p2), [#allocation2], %s779_s5 }
  0x8d   : > { %1054 = dma.done.wait (%p1527_p0), %s289_s7, 128  }
  0x8e   : > { %1056 = vsyncadd (%p1527_p0), %s289_s7, 4294967168  ;;  %s297_s16 = sand.u32 1, %s1162_s25   ;;  %s301_s29 = scalar_lea.vmem [#allocation5], %s779_s5 }
  0x8f   : > { %s298_s20 = scalar_lea.sflag [#allocation6], %s297_s16 }
  0x90   : > { %1058 = dma.done.wait (%p1527_p0), %s298_s20, 128  }
  0x91   : > { %1060 = vsyncadd (%p1527_p0), %s298_s20, 4294967168  ;;  %p1528_p4 = scmp.eq.s32.totalorder %s1162_s25, 0 }
  0x93   : > { %1062 = dma.done.wait (%p1528_p4), [#allocation6], 128   ;;  %p1529_p11 = pmov %p1528_p4 }
  0x94   : > { %p1530_p8 = pmov %p1528_p4 }
  0x95   : > { %1064 = vsyncadd (%p1529_p11), [#allocation6], 4294967168 }
  0x96   : > { %1066 = dma.done.wait (%p1530_p8), [#allocation9], 512   ;;  %p1531_p12 = pmov %p1528_p4 }
  0x97   : > { %p348_p3 = scmp.lt.s32.totalorder %s1162_s25, 1  ;;  %v353_v0 = vld [vmem:[%s292_s17] sm:$0xff]  ;;  %v354_v1 = vld [vmem:[%s301_s29] sm:$0xff]  ;;  %s1095_s11 = smov 1   ;;  %v1101_v6 = vmov 0.0   ;;  %v1103_v7 = vmov 0   ;;  %v369_v9 = vlaneseq }
  0x98   : > { %1068 = vsyncadd (%p1531_p12), [#allocation9], 4294966784  ;;  %v355_v3 = vadd.f32 %v354_v1, %v353_v0  ;;  %s1096_s10 = smov 16   ;;  %s1097_s9 = smov 17   ;;  %617 = vmatprep.mubr.f32.mxu0 %v1101_v6  ;;  %892 = vset.pattern.permute.xlu0 %v1103_v7  ;;  %v537_v8 = vld [vmem:[%s1507_s4] sm:$0xff]  ;;  %v1390_v16 = vld [vmem:[#allocation8] sm:$0xff] }
  0x99   : > { %s349_s18 = scalar_select %p348_p3, %s1162_s25, 1  ;;  %v1385_v10 = vshrl.u32 %v369_v9, 7  ;;  %v1387_v13 = vand.u32 127, %v369_v9  ;;  %v1392_v17 = vld [vmem:[#allocation8 + $0x8] sm:$0xff]  ;;  %vm527_vm4 = vcmask 1043456   ;;  %vm543_vm9 = vcmask 293888  }
  0x9a   : > { %s1098_s14 = smov 15   ;;  %s1099_s15 = smov 127  }
  0x9b   : > { %s798_s13 = sshll.u32 %s349_s18, 3  ;;  %s1100_s26 = smov 112   ;;  %v427_v14 = vsub.s32 3, %v1385_v10  ;;  %vm422_vm0 = vcmp.lt.s32.totalorder %v1387_v13, 1  ;;  %v376_v19 = vsub.s32 0, %v1385_v10  ;;  %v410_v20 = vsub.s32 2, %v1385_v10 }
  0x9c   : > { %s352_s3 = scalar_lea.vmem %s1505_s2, %s798_s13  ;;  %s1102_s5 = smov 113   ;;  %v393_v21 = vsub.s32 1, %v1385_v10  ;;  %vm371_vm1 = vcmp.lt.s32.totalorder %v1387_v13, 17  ;;  %vm405_vm2 = vcmp.lt.s32.totalorder %v1387_v13, 15  ;;  %v444_v28 = vsub.s32 5, %v1385_v10 }
  0x9d   : > { %v356_v2 = vld [vmem:[%s352_s3] sm:$0xff]  ;;  %s1104_s7 = smov 111   ;;  %v428_v22 = vrot.slane %v1390_v16, %v427_v14  ;;  %v432_v23 = vrot.slane %v1392_v17, %v427_v14  ;;  %v377_v29 = vrot.slane %v1390_v16, %v376_v19  ;;  %v381_v30 = vrot.slane %v1392_v17, %v376_v19  ;;  %s783_s20 = sshll.u32 %s1334_s12, 4 }
  0x9e   : > { %v1360_v4 = vadd.f32 %v356_v2, %v355_v3  ;;  %v411_v31 = vrot.slane %v1390_v16, %v410_v20  ;;  %v415_v32 = vrot.slane %v1392_v17, %v410_v20  ;;  %vm388_vm3 = vcmp.lt.s32.totalorder %v1387_v13, 16  ;;  %s799_s29 = sshll.u32 %s1162_s25, 8  ;;  %s347_s18 = scalar_lea.vmem [#allocation10], %s783_s20 }
  0x9f   : > { %v394_v33 = vrot.slane %v1390_v16, %v393_v21  ;;  %v398_v34 = vrot.slane %v1392_v17, %v393_v21  ;;  %vm439_vm5 = vcmp.lt.s32.totalorder %v1387_v13, 127  ;;  %v478_v37 = vsub.s32 7, %v1385_v10  ;;  %s643_s13 = sshll.u32 %s347_s18, 4  ;;  %s1459_s3 = scalar_lea.hbm %s1509_s6, %s799_s29  ;;  %s1461_s13 = int_to_ptr.vmem [resolvable:$true] %s643_s13 }
  0xa0   : > { %418 = vrot.lane.b32.xlu1 %v1360_v4, %s1095_s11  ;;  %384 = vrot.lane.b32.xlu0 %v1360_v4, %s1096_s10  ;;  %v1366_v5 = vcombine.high %v1360_v4, %v1360_v4  ;;  %v445_v42 = vrot.slane %v1390_v16, %v444_v28  ;;  %v449_v43 = vrot.slane %v1392_v17, %v444_v28  ;;  %vm473_vm6 = vcmp.lt.s32.totalorder %v1387_v13, 112  ;;  %p1532_p10 = scmp.ne.s32.totalorder %s1523_s30, 0  ;;  %s1105_s25 = smov [#allocation10]  }
  0xa1   : > { %v479_v54 = vrot.slane %v1390_v16, %v478_v37  ;;  %v483_v63 = vrot.slane %v1392_v17, %v478_v37  ;;  %v461_v0 = vsub.s32 6, %v1385_v10  ;;  %vm456_vm7 = vcmp.lt.s32.totalorder %v1387_v13, 113 }
  0xa2   : > { %vm490_vm8 = vcmp.lt.s32.totalorder %v1387_v13, 111  ;;  %v786_v13 = vld [vmem:[#allocation8 + $0x10] ss:$0 sm:$0xff] }
  0xa3   : > { %v462_v20 = vrot.slane %v1390_v16, %v461_v0  ;;  %v466_v21 = vrot.slane %v1392_v17, %v461_v0 }
  0xa4   : > { %365 = vrot.lane.b32.xlu0 %v1360_v4, %s1097_s9  ;;  %420 = vrot.lane.b32.xlu1 %v1366_v5, %s1095_s11  ;;  %s629_s11 = scalar_lea.sflag [#allocation4], %s1334_s12 }
  0xa8   : > { %401 = vrot.lane.b32.xlu0 %v1360_v4, %s1098_s14  ;;  %367 = vrot.lane.b32.xlu1 %v1366_v5, %s1097_s9  ;;  %s1013_s9 = sshll.u32 %s1105_s25, 4  ;;  %s1014_s9 = int_to_ptr.vmem [resolvable:$false] %s1013_s9 }
  0xa9   : > { %p1016_p9 = scmp.lt.s32.totalorder %s1461_s13, %s1014_s9 }
  0xac   : > { %403 = vrot.lane.b32.xlu1 %v1366_v5, %s1098_s14  ;;  %386 = vrot.lane.b32.xlu0 %v1366_v5, %s1096_s10  ;;  %s1009_s10 = scalar_lea.vmem %s1461_s13, 256  ;;  %s1015_s14 = scalar_lea.vmem %s1014_s9, 512 }
  0xad   : > { %p1010_p7 = scmp.ne.s32.totalorder %s1461_s13, %s1009_s10  ;;  %p1017_p1 = scmp.lt.s32.totalorder %s1015_s14, %s1009_s10 }
  0xaf   : > { %p1011_p13 = pnand %p1010_p7, %p1532_p10  ;;  %p1018_p6 = por %p1017_p1, %p1016_p9 }
  0xb0   : > { %437 = vrot.lane.b32.xlu1 %v1366_v5, %s1099_s15  ;;  %435 = vrot.lane.b32.xlu0 %v1360_v4, %s1099_s15 }
  0xb1   : > { %p1012_p5 = pneg %p1011_p13 }
  0xb3   : > { %p1019_p2 = pnand %p1018_p6, %p1012_p5 }
  0xb4   : > { %471 = vrot.lane.b32.xlu1 %v1366_v5, %s1100_s26  ;;  %469 = vrot.lane.b32.xlu0 %v1360_v4, %s1100_s26 }
  0xb8   : > { %454 = vrot.lane.b32.xlu1 %v1366_v5, %s1102_s5  ;;  %452 = vrot.lane.b32.xlu0 %v1360_v4, %s1102_s5 }
  0xbc   : > { %488 = vrot.lane.b32.xlu1 %v1366_v5, %s1104_s7  ;;  %486 = vrot.lane.b32.xlu0 %v1360_v4, %s1104_s7 }
  0xc0   : > { %540 = vperm.xlu0 %892, %v537_v8  }
 0x112   : > { %v419_v11 = vpop.permute.xlu1 %418  ;;  %v385_v12 = vpop.permute.xlu0 %384 }
 0x116   : > { %v366_v15 = vpop.permute.xlu0 %365  ;;  %v421_v18 = vpop.permute.xlu1 %420 }
 0x117   : > { %v423_v24 = vsel %vm422_vm0, %v419_v11, %v421_v18  ;;  %v424_v25 = vsel %vm422_vm0, %v421_v18, %v419_v11 }
 0x118   : > { %v433_v35 = vmul.f32 %v428_v22, %v424_v25  ;;  %v434_v36 = vmul.f32 %v432_v23, %v423_v24 }
 0x11a   : > { %v402_v26 = vpop.permute.xlu0 %401  ;;  %v368_v27 = vpop.permute.xlu1 %367  ;;  %v511_v52 = vrot.slane %v433_v35, 4  ;;  %v512_v53 = vrot.slane %v434_v36, 4 }
 0x11b   : > { %v372_v38 = vsel %vm371_vm1, %v366_v15, %v368_v27  ;;  %v373_v39 = vsel %vm371_vm1, %v368_v27, %v366_v15 }
 0x11c   : > { %v382_v55 = vmul.f32 %v377_v29, %v373_v39  ;;  %v383_v56 = vmul.f32 %v381_v30, %v372_v38 }
 0x11e   : > { %v404_v40 = vpop.permute.xlu1 %403  ;;  %v387_v41 = vpop.permute.xlu0 %386 }
 0x11f   : > { %v406_v44 = vsel %vm405_vm2, %v402_v26, %v404_v40  ;;  %v407_v45 = vsel %vm405_vm2, %v404_v40, %v402_v26  ;;  %v389_v46 = vsel %vm388_vm3, %v385_v12, %v387_v41  ;;  %v390_v47 = vsel %vm388_vm3, %v387_v41, %v385_v12 }
 0x120   : > { %v416_v48 = vmul.f32 %v411_v31, %v407_v45  ;;  %v417_v49 = vmul.f32 %v415_v32, %v406_v44  ;;  %v399_v50 = vmul.f32 %v394_v33, %v390_v47  ;;  %v400_v51 = vmul.f32 %v398_v34, %v389_v46  ;;  %v787_v32 = vld [vmem:[#allocation8 + $0x18] ss:$0 sm:$0xff] }
 0x122   : > { %v505_v57 = vrot.slane %v399_v50, 4  ;;  %v506_v58 = vrot.slane %v400_v51, 4  ;;  %v438_v59 = vpop.permute.xlu1 %437  ;;  %v436_v60 = vpop.permute.xlu0 %435  ;;  %v531_v2 = vsel %vm527_vm4, %v417_v49, %v512_v53  ;;  %v530_v6 = vsel %vm527_vm4, %v416_v48, %v511_v52 }
 0x123   : > { %v440_v61 = vsel %vm439_vm5, %v436_v60, %v438_v59  ;;  %v441_v62 = vsel %vm439_vm5, %v438_v59, %v436_v60 }
 0x124   : > { %v529_v1 = vsel %vm527_vm4, %v383_v56, %v506_v58  ;;  %v528_v3 = vsel %vm527_vm4, %v382_v55, %v505_v57  ;;  %v450_v9 = vmul.f32 %v445_v42, %v440_v61  ;;  %v451_v11 = vmul.f32 %v449_v43, %v441_v62 }
 0x125   : > { %v800_v7 = vpack.c.bf16 %v531_v2, %v529_v1  ;;  %v802_v8 = vpack.c.bf16 %v530_v6, %v528_v3 }
 0x126   : > { %v472_v12 = vpop.permute.xlu1 %471  ;;  %v470_v14 = vpop.permute.xlu0 %469  ;;  %v517_v22 = vrot.slane %v450_v9, 4  ;;  %v518_v23 = vrot.slane %v451_v11, 4 }
 0x127   : > { %v474_v15 = vsel %vm473_vm6, %v470_v14, %v472_v12  ;;  %v475_v10 = vsel %vm473_vm6, %v472_v12, %v470_v14  ;;  %801 = vmatprep.subr.bf16.mxu0 %v800_v7 }
 0x128   : > { %v484_v18 = vmul.f32 %v479_v54, %v474_v15  ;;  %v485_v19 = vmul.f32 %v483_v63, %v475_v10  ;;  %803 = vmatpush1.bf16.msra.mxu0 %v802_v8  ;;  %v533_v34 = vsel %vm527_vm4, %v1366_v5, %v518_v23  ;;  %v532_v35 = vsel %vm527_vm4, %v1360_v4, %v517_v22  ;;  %v536_v5 = vld [vmem:[#allocation7] sm:$0xff] }
 0x12a   : > { %v455_v24 = vpop.permute.xlu1 %454  ;;  %v453_v25 = vpop.permute.xlu0 %452  ;;  %v523_v28 = vrot.slane %v484_v18, 4  ;;  %v524_v29 = vrot.slane %v485_v19, 4 }
 0x12b   : > { %v457_v26 = vsel %vm456_vm7, %v453_v25, %v455_v24  ;;  %v458_v27 = vsel %vm456_vm7, %v455_v24, %v453_v25 }
 0x12c   : > { %v467_v30 = vmul.f32 %v462_v20, %v457_v26  ;;  %v468_v31 = vmul.f32 %v466_v21, %v458_v27 }
 0x12e   : > { %v489_v33 = vpop.permute.xlu1 %488  ;;  %v535_v16 = vsel %vm527_vm4, %v468_v31, %v524_v29  ;;  %v487_v17 = vpop.permute.xlu0 %486  ;;  %v534_v36 = vsel %vm527_vm4, %v467_v30, %v523_v28 }
 0x12f   : > { %v804_v37 = vpack.c.bf16 %v535_v16, %v533_v34  ;;  %v491_v38 = vsel %vm490_vm8, %v487_v17, %v489_v33  ;;  %v492_v39 = vsel %vm490_vm8, %v489_v33, %v487_v17  ;;  %v806_v40 = vpack.c.bf16 %v534_v36, %v532_v35 }
 0x130   : > { %v502_v41 = vmul.f32 %v787_v32, %v492_v39  ;;  %v501_v42 = vmul.f32 %v786_v13, %v491_v38 }
 0x131   : > { %805 = vmatprep.subr.bf16.mxu0 %v804_v37 }
 0x132   : > { %807 = vmatpush1.bf16.msra.mxu0 %v806_v40 }
 0x133   : > { %788 = vmatprep.subr.msk.mxu0 %vm527_vm4, %v502_v41 }
 0x136   : > { %789 = vmatpush1.msk.msra.mxu0 %vm527_vm4, %v501_v42 }
 0x137   : > { %790 = vmatmul.mubr.msk.f32.vlgmr.msra.gmra.mrb[0].mxu0 %vm543_vm9, %v536_v5 }
 0x13f   : > { %v541_v4 = vpop.permute.xlu0 %540 }
 0x20a   : > { %v619_v43 = vpop.f32.mrb[0].mxu0 }
 0x20b   : > { %v620_v44 = vadd.f32 %v619_v43, %v541_v4  ;;  %v621_v45 = vpop.f32.mrb[1].mxu0 }
 0x20c   : > { %v622_v46 = vadd.f32 %v621_v45, %v541_v4 }
 0x20d   : > { %v624_v47 = vmax.f32 %v620_v44, 0.0 }
 0x20e   : > { %v625_v48 = vmax.f32 %v622_v46, 0.0 }
 0x20f   : > { %626 = vst [vmem:[%s347_s18] sm:$0xff] %v624_v47 }
 0x210   : > { %627 = vst [vmem:[%s347_s18 + $0x8] sm:$0xff] %v625_v48 }
 0x211   : > { %1022 = shalt.err (!%p1019_p2)
}
 0x212   : > { %s1023_s12 = scalar_lea.hbm %s1459_s3, 256  ;;  %s1027_s5 = scalar_lea.hbm %s1509_s6, 512 }
 0x213   : > { %p1024_p0 = scmp.ne.s32.totalorder %s1459_s3, %s1023_s12  ;;  %p1028_p8 = scmp.lt.u32.totalorder %s1459_s3, %s1509_s6 }
 0x214   : > { %p1029_p12 = scmp.lt.u32.totalorder %s1027_s5, %s1023_s12  ;;  %p1031_p7 = scmp.lt.u32.totalorder %s1023_s12, %s1459_s3 }
 0x215   : > { %p1025_p4 = pnand %p1024_p0, %p1532_p10 }
 0x216   : > { %p1030_p3 = por %p1029_p12, %p1028_p8 }
 0x217   : > { %p1026_p11 = pneg %p1025_p4 }
 0x218   : > { %p1032_p13 = por %p1031_p7, %p1030_p3 }
 0x21a   : > { %p1033_p5 = pnand %p1032_p13, %p1026_p11 }
 0x21c   : > { %1036 = shalt.err (!%p1033_p5)
}
 0x21d   : > { %820 = dma.vmem_to_hbm [thread:$0]  (%p1532_p10), %s1461_s13, 256, %s1459_s3, %s629_s11  }
 0x21e PF: > { %s655_s16 = sand.u32 1, %s1075_s21   ;;  %p1533_p9 = scmp.ne.s32.totalorder %s1517_s28, 0 }
 0x21f   : > { %p1534_p1 = scmp.ge.s32.totalorder %s1087_s24, 2  ;;  %s656_s20 = scalar_lea.sflag [#allocation4], %s655_s16 }
 0x221   : > { %p837_p6 = pnand %p1534_p1, %p1533_p9 }
 0x223   : > { %1070 = dma.done.wait (!%p837_p6), %s656_s20, 256  }
 0x224   : > { %1072 = vsyncadd (!%p837_p6), %s656_s20, 4294967040  ;;  %s1535_s29 = sld [smem:[#allocation16_spill]]  ;;  %p23_p2 = scmp.ge.s32.totalorder %s1244_s19, 4  }
 0x225   : > { %s1536_s21 = smov %s1079_s22  ;;  %s1537_s22 = smov %s1083_s23 }
 0x226   : > { %s1539_s24 = smov %s1244_s19  ;;  %25 = sbr.rel (!%p23_p2) target bundleno = 11 (0xb), region = 113 }
 0x22a   : > { %s1538_s23 = smov %s1535_s29 }
 0x22d   :  { %661 = vsyncpa [#allocation3], 1 }
 0x22e   :  { %663 = vsyncpa [#allocation3 + $0x1], 1 }
 0x22f   :  { %664 = vsyncpa [#allocation6], 1 }
 0x230   :  { %666 = vsyncpa [#allocation6 + $0x1], 1 }
 0x231   :  { %667 = vsyncpa [#allocation9], 1 }
 0x232   :  { %668 = vsyncpa [#allocation4], 1 }
 0x233   :  { %670 = vsyncpa [#allocation4 + $0x1], 1 }

</bundles_post_ra>
